<compile_context>
chip_gen: v7x
topology: tpu7x:2x2x1
jax: 0.10.0
libtpu: 0.0.40
codegen_flags: <defaults>
</compile_context>

<pallas_src>
import functools

import jax
import jax.numpy as jnp
from jax.experimental import pallas as pl
from jax.experimental.pallas import tpu as pltpu

_LANES = 128
_SUBLANES = 8
_MAX_TILE_ROWS = 2048          # (2048,128) f32 = 1 MiB per input block
_CLAMP = -100.0                # torch BCELoss clamps each log term at -100


def _bce_kernel(x_ref, t_ref, o_ref, acc_ref, *,
                par_last, inner_last, valid_rows_last):
    p = pl.program_id(0)
    j = pl.program_id(1)

    @pl.when(j == 0)
    def _():
        acc_ref[...] = jnp.zeros_like(acc_ref)

    x = x_ref[...].astype(jnp.float32)
    t = t_ref[...].astype(jnp.float32)

    # BCE: -(t*log(x) + (1-t)*log(1-x)), each log clamped to >= -100
    # (clamp BEFORE the multiply so t=1/x=1 padding gives exactly 0).
    log_x = jnp.maximum(jnp.log(x), _CLAMP)
    log_1mx = jnp.maximum(jnp.log(1.0 - x), _CLAMP)
    loss = -(t * log_x + (1.0 - t) * log_1mx)

    rows, lanes = loss.shape
    if valid_rows_last != rows:
        # Only the globally-last tile is partial; rows past valid_rows_last
        # read out-of-bounds (unspecified) data and must be zeroed.  This
        # branch is only emitted when the input is actually ragged, and uses
        # local row indices (no int32-overflow-prone global flat index).
        is_last_tile = jnp.logical_and(p == par_last, j == inner_last)
        limit = jnp.where(is_last_tile, valid_rows_last, rows)
        row_idx = jax.lax.broadcasted_iota(jnp.int32, (rows, lanes), 0)
        loss = jnp.where(row_idx < limit, loss, 0.0)

    # Lane-wide partial-sum accumulation: reshape keeps (8,128) vregs intact,
    # so the reduction over axis 0 is pure VPU adds (no XLU in the hot loop).
    acc_ref[...] += jnp.sum(
        loss.reshape(rows // _SUBLANES, _SUBLANES, lanes), axis=0)

    @pl.when(j == pl.num_programs(1) - 1)
    def _():
        # Single cross-sublane reduce per partition; output stays lane-dense.
        o_ref[...] = jnp.sum(acc_ref[...], axis=0, keepdims=True)


def bce_loss(inputs, targets):
    """Mean binary cross entropy, semantics of torch.nn.BCELoss()."""
    assert inputs.shape == targets.shape
    n_total = int(inputs.size)

    x = jnp.ravel(inputs)
    t = jnp.ravel(targets)

    # Pad (with 1.0 => exactly zero loss after the clamp) only up to one
    # (8,128) vreg tile, and only if the flat length actually needs it.
    vreg_elems = _SUBLANES * _LANES
    n_pad = pl.cdiv(n_total, vreg_elems) * vreg_elems
    if n_pad != n_total:
        pad = n_pad - n_total
        x = jnp.pad(x, (0, pad), constant_values=1.0)
        t = jnp.pad(t, (0, pad), constant_values=1.0)

    rows = n_pad // _LANES                       # multiple of 8
    x2 = x.reshape(rows, _LANES)
    t2 = t.reshape(rows, _LANES)

    tile_rows = min(_MAX_TILE_ROWS, rows)        # large blocks past the DMA knee
    num_tiles = pl.cdiv(rows, tile_rows)
    valid_rows_last = rows - (num_tiles - 1) * tile_rows

    # Outer 'parallel' axis over disjoint tile ranges (v7x: 2 TensorCores);
    # inner 'arbitrary' reduction axis.
    n_par = next(p for p in (8, 4, 2, 1) if num_tiles % p == 0)
    inner_tiles = num_tiles // n_par

    kernel = functools.partial(
        _bce_kernel,
        par_last=n_par - 1,
        inner_last=inner_tiles - 1,
        valid_rows_last=valid_rows_last,
    )

    itemsize = jnp.dtype(inputs.dtype).itemsize
    cost = pl.CostEstimate(
        flops=8 * n_total,
        transcendentals=2 * n_total,
        bytes_accessed=2 * n_total * itemsize + n_par * _LANES * 4,
    )

    partials = pl.pallas_call(
        kernel,
        out_shape=jax.ShapeDtypeStruct((n_par, _LANES), jnp.float32),
        grid_spec=pltpu.PrefetchScalarGridSpec(
            num_scalar_prefetch=0,
            grid=(n_par, inner_tiles),
            in_specs=[
                pl.BlockSpec((tile_rows, _LANES),
                             lambda p, j: (p * inner_tiles + j, 0)),
                pl.BlockSpec((tile_rows, _LANES),
                             lambda p, j: (p * inner_tiles + j, 0)),
            ],
            out_specs=pl.BlockSpec((1, _LANES), lambda p, j: (p, 0)),
            scratch_shapes=[pltpu.VMEM((_SUBLANES, _LANES), jnp.float32)],
        ),
        compiler_params=pltpu.CompilerParams(
            dimension_semantics=("parallel", "arbitrary"),
        ),
        cost_estimate=cost,
    )(x2, t2)

    return jnp.sum(partials) / jnp.float32(n_total)


if __name__ == "__main__":
    key = jax.random.PRNGKey(0)
    k1, k2 = jax.random.split(key)

    # Small shapes consistent with a segmentation-style BCE use case (NCHW).
    B, C, H, W = 2, 4, 16, 16
    logits = jax.random.normal(k1, (B, C, H, W), dtype=jnp.float32)
    inputs = jax.nn.sigmoid(logits)                      # probabilities in (0, 1)
    targets = (jax.random.uniform(k2, (B, C, H, W)) > 0.5).astype(jnp.float32)

    loss = bce_loss(inputs, targets)
    jax.block_until_ready(loss)

    # Reference check (pure JAX, same clamped-log semantics as torch BCELoss).
    log_x = jnp.maximum(jnp.log(inputs), -100.0)
    log_1mx = jnp.maximum(jnp.log(1.0 - inputs), -100.0)
    ref = jnp.mean(-(targets * log_x + (1.0 - targets) * log_1mx))
    assert jnp.allclose(loss, ref, rtol=1e-5, atol=1e-6), (loss, ref)

    print("KERNEL_OK")
</pallas_src>

<mosaic_0001>
module attributes {stable_mosaic.version = 11 : i64} {
  func.func @_bce_kernel(%arg0: i32, %arg1: i32, %arg2: memref<16x128xf32, #tpu.memory_space<vmem>>, %arg3: memref<16x128xf32, #tpu.memory_space<vmem>>, %arg4: memref<1x128xf32, #tpu.memory_space<vmem>>, %arg5: memref<8x128xf32, #tpu.memory_space<vmem>>) attributes {dimension_semantics = [#tpu.dimension_semantics<parallel>, #tpu.dimension_semantics<arbitrary>], iteration_bounds = array<i64: 1, 1>, scalar_prefetch = 0 : i64, scratch_operands = 1 : i64, tpu.core_type = #tpu.core_type<tc>, window_params = [{transform_indices = @transform_0, window_bounds = array<i64: 16, 128>}, {transform_indices = @transform_1, window_bounds = array<i64: 16, 128>}, {transform_indices = @transform_2, window_bounds = array<i64: 1, 128>}]} {
    %c0_i32 = arith.constant 0 : i32
    %0 = arith.cmpi eq, %arg1, %c0_i32 : i32
    %1 = arith.extui %0 : i1 to i32
    %c0_i32_0 = arith.constant 0 : i32
    %2 = arith.cmpi ne, %1, %c0_i32_0 : i32
    scf.if %2 {
      %cst_15 = arith.constant 0.000000e+00 : f32
      %28 = vector.broadcast %cst_15 : f32 to vector<8x128xf32>
      %c0_16 = arith.constant 0 : index
      %c0_17 = arith.constant 0 : index
      %29 = vector.load %arg5[%c0_16, %c0_17] : memref<8x128xf32, #tpu.memory_space<vmem>>, vector<8x128xf32>
      tpu.vector_store %arg5[%c0_16, %c0_17], %28 {strides = array<i32>} : memref<8x128xf32, #tpu.memory_space<vmem>>, vector<8x128xf32>,
    } else {
    }
    %c0 = arith.constant 0 : index
    %c0_1 = arith.constant 0 : index
    %3 = vector.load %arg2[%c0, %c0_1] : memref<16x128xf32, #tpu.memory_space<vmem>>, vector<16x128xf32>
    %c0_2 = arith.constant 0 : index
    %c0_3 = arith.constant 0 : index
    %4 = vector.load %arg3[%c0_2, %c0_3] : memref<16x128xf32, #tpu.memory_space<vmem>>, vector<16x128xf32>
    %5 = math.log %3 : vector<16x128xf32>
    %cst = arith.constant -1.000000e+02 : f32
    %6 = vector.broadcast %cst : f32 to vector<16x128xf32>
    %7 = arith.maximumf %5, %6 : vector<16x128xf32>
    %cst_4 = arith.constant 1.000000e+00 : f32
    %8 = vector.broadcast %cst_4 : f32 to vector<16x128xf32>
    %9 = arith.subf %8, %3 : vector<16x128xf32>
    %10 = math.log %9 : vector<16x128xf32>
    %cst_5 = arith.constant -1.000000e+02 : f32
    %11 = vector.broadcast %cst_5 : f32 to vector<16x128xf32>
    %12 = arith.maximumf %10, %11 : vector<16x128xf32>
    %13 = arith.mulf %4, %7 : vector<16x128xf32>
    %cst_6 = arith.constant 1.000000e+00 : f32
    %14 = vector.broadcast %cst_6 : f32 to vector<16x128xf32>
    %15 = arith.subf %14, %4 : vector<16x128xf32>
    %16 = arith.mulf %15, %12 : vector<16x128xf32>
    %17 = arith.addf %13, %16 : vector<16x128xf32>
    %cst_7 = arith.constant 0.000000e+00 : f32
    %18 = vector.broadcast %cst_7 : f32 to vector<16x128xf32>
    %19 = arith.subf %18, %17 : vector<16x128xf32>
    %c0_8 = arith.constant 0 : index
    %c0_9 = arith.constant 0 : index
    %20 = vector.load %arg5[%c0_8, %c0_9] : memref<8x128xf32, #tpu.memory_space<vmem>>, vector<8x128xf32>
    %21 = vector.shape_cast %19 : vector<16x128xf32> to vector<2x8x128xf32>
    %cst_10 = arith.constant dense<0.000000e+00> : vector<8x128xf32>
    %22 = vector.multi_reduction <add>, %21, %cst_10 [0] : vector<2x8x128xf32> to vector<8x128xf32>
    %23 = arith.addf %20, %22 : vector<8x128xf32>
    %c0_11 = arith.constant 0 : index
    %c0_12 = arith.constant 0 : index
    %24 = vector.load %arg5[%c0_11, %c0_12] : memref<8x128xf32, #tpu.memory_space<vmem>>, vector<8x128xf32>
    tpu.vector_store %arg5[%c0_11, %c0_12], %23 {strides = array<i32>} : memref<8x128xf32, #tpu.memory_space<vmem>>, vector<8x128xf32>,
    %c0_i32_13 = arith.constant 0 : i32
    %25 = arith.cmpi eq, %arg1, %c0_i32_13 : i32
    %26 = arith.extui %25 : i1 to i32
    %c0_i32_14 = arith.constant 0 : i32
    %27 = arith.cmpi ne, %26, %c0_i32_14 : i32
    scf.if %27 {
      %c0_15 = arith.constant 0 : index
      %c0_16 = arith.constant 0 : index
      %28 = vector.load %arg5[%c0_15, %c0_16] : memref<8x128xf32, #tpu.memory_space<vmem>>, vector<8x128xf32>
      %cst_17 = arith.constant dense<0.000000e+00> : vector<128xf32>
      %29 = vector.multi_reduction <add>, %28, %cst_17 [0] : vector<8x128xf32> to vector<128xf32>
      %30 = vector.shape_cast %29 : vector<128xf32> to vector<1x128xf32>
      %c0_18 = arith.constant 0 : index
      %c0_19 = arith.constant 0 : index
      %31 = vector.load %arg4[%c0_18, %c0_19] : memref<1x128xf32, #tpu.memory_space<vmem>>, vector<1x128xf32>
      tpu.vector_store %arg4[%c0_18, %c0_19], %30 {strides = array<i32>} : memref<1x128xf32, #tpu.memory_space<vmem>>, vector<1x128xf32>,
    } else {
    }
    return
  }
  func.func @transform_0(%arg0: i32, %arg1: i32) -> (i32, i32) {
    %c1_i32 = arith.constant 1 : i32
    %0 = arith.muli %arg0, %c1_i32 : i32
    %1 = arith.addi %0, %arg1 : i32
    %c0_i32 = arith.constant 0 : i32
    %c0_i32_0 = arith.constant 0 : i32
    return %1, %c0_i32 : i32, i32
  }
  func.func @transform_1(%arg0: i32, %arg1: i32) -> (i32, i32) {
    %c1_i32 = arith.constant 1 : i32
    %0 = arith.muli %arg0, %c1_i32 : i32
    %1 = arith.addi %0, %arg1 : i32
    %c0_i32 = arith.constant 0 : i32
    %c0_i32_0 = arith.constant 0 : i32
    return %1, %c0_i32 : i32, i32
  }
  func.func @transform_2(%arg0: i32, %arg1: i32) -> (i32, i32) {
    %c0_i32 = arith.constant 0 : i32
    %c0_i32_0 = arith.constant 0 : i32
    return %arg0, %c0_i32 : i32, i32
  }
}

</mosaic_0001>

<bundles_post_ra>
// kernel: tpu_custom_call.1
= control target key start
LH: loop header
LB: loop body
LE: loop exit
PB: predicated region body
PF: predicated region fallthrough
CT: control target
= control target key end

     0   :  { %7 = vsyncpa [#allocation4], 0  ;;  %s257_s0 = inlined_call_operand.hbm [shape: f32[16,128], index: 0, kind: input, shape index: {}]   ;;  %s258_s1 = inlined_call_operand.hbm [shape: f32[16,128], index: 1, kind: input, shape index: {}]   ;;  %s259_s2 = inlined_call_operand.hbm [shape: f32[1,128], index: 2, kind: output, shape index: {}]  }
   0x1   :  { %8 = vsyncpa [#allocation7], 0 }
   0x2   :  { %9 = vsyncpa [#allocation5], 0  ;;  %s201_s9 = smov [#allocation3]   ;;  %s129_s13 = scalar_lea.hbm %s257_s0, 256 }
   0x3   :  { %s19_s10 = sshll.u32 %s201_s9, 4  ;;  %p130_p0 = scmp.ne.s32.totalorder %s257_s0, %s129_s13  ;;  %s20_s10 = int_to_ptr.vmem [resolvable:$true] %s19_s10 }
   0x4   :  { %p133_p1 = scmp.lt.u32.totalorder %s129_s13, %s257_s0 }
   0x6   :  { %p135_p2 = pnand %p133_p1, %p130_p0 }
   0x8   :  { %138 = shalt.err (!%p135_p2)
}
   0x9   :  { %s139_s18 = scalar_lea.vmem %s20_s10, 256  ;;  %p144_p4 = scmp.lt.s32.totalorder %s20_s10, %s20_s10 }
   0xa   :  { %p140_p3 = scmp.ne.s32.totalorder %s20_s10, %s139_s18  ;;  %p145_p5 = scmp.lt.s32.totalorder %s139_s18, %s139_s18 }
   0xc   :  { %p146_p6 = por %p145_p5, %p144_p4 }
   0xe   :  { %p147_p7 = pnand %p146_p6, %p140_p3 }
  0x10   :  { %150 = shalt.err (!%p147_p7)
}
  0x11   :  { %s202_s19 = smov 128   ;;  %s203_s20 = smov 8  }
  0x12   :  { %25 = dma.hbm_to_vmem [thread:$0]  %s257_s0, 256, %s20_s10, [#allocation4], %s202_s19, %s202_s19, %s203_s20  }
  0x13   :  { %s204_s23 = smov [#allocation6]   ;;  %s151_s27 = scalar_lea.hbm %s258_s1, 256 }
  0x14   :  { %s35_s24 = sshll.u32 %s204_s23, 4  ;;  %p152_p8 = scmp.ne.s32.totalorder %s258_s1, %s151_s27  ;;  %s36_s24 = int_to_ptr.vmem [resolvable:$true] %s35_s24 }
  0x15   :  { %p155_p9 = scmp.lt.u32.totalorder %s151_s27, %s258_s1 }
  0x17   :  { %p157_p10 = pnand %p155_p9, %p152_p8 }
  0x19   :  { %160 = shalt.err (!%p157_p10)
}
  0x1a   :  { %s161_s4 = scalar_lea.vmem %s36_s24, 256  ;;  %p166_p12 = scmp.lt.s32.totalorder %s36_s24, %s36_s24 }
  0x1b   :  { %p162_p11 = scmp.ne.s32.totalorder %s36_s24, %s161_s4  ;;  %p167_p13 = scmp.lt.s32.totalorder %s161_s4, %s161_s4 }
  0x1d   :  { %p168_p0 = por %p167_p13, %p166_p12 }
  0x1f   :  { %p169_p1 = pnand %p168_p0, %p162_p11 }
  0x21   :  { %172 = shalt.err (!%p169_p1)
}
  0x22   :  { %41 = dma.hbm_to_vmem [thread:$0]  %s258_s1, 256, %s36_s24, [#allocation7], %s202_s19, %s202_s19, %s203_s20  }
  0x23   :  { %195 = dma.done.wait [#allocation4], 256  }
  0x24   :  { %196 = vsyncadd [#allocation4], 4294967040 }
  0x25   :  { %197 = dma.done.wait [#allocation7], 256  }
  0x26   :  { %198 = vsyncadd [#allocation7], 4294967040  ;;  %v57_v0 = vld [vmem:[#allocation3] sm:$0xff]  ;;  %v58_v1 = vld [vmem:[#allocation3 + $0x8] sm:$0xff]  ;;  %s205_s1 = smov [#allocation8]  }
  0x27   :  { %121 = vlog2.f32 %v57_v0  ;;  %v67_v2 = vsub.f32 1.0, %v57_v0  ;;  %v68_v3 = vsub.f32 1.0, %v58_v1  ;;  %v59_v5 = vld [vmem:[#allocation6] sm:$0xff]  ;;  %v60_v7 = vld [vmem:[#allocation6 + $0x8] sm:$0xff]  ;;  %s106_s6 = sshll.u32 %s205_s1, 4  ;;  %s107_s6 = int_to_ptr.vmem [resolvable:$true] %s106_s6 }
  0x28   :  { %123 = vlog2.f32 %v58_v1  ;;  %v77_v14 = vsub.f32 1.0, %v59_v5  ;;  %v78_v17 = vsub.f32 1.0, %v60_v7  ;;  %s173_s7 = scalar_lea.vmem %s107_s6, 16  ;;  %s177_s8 = scalar_lea.vmem %s107_s6, 32 }
  0x29   :  { %125 = vlog2.f32 %v67_v2  ;;  %p174_p2 = scmp.ne.s32.totalorder %s107_s6, %s173_s7  ;;  %p178_p3 = scmp.lt.s32.totalorder %s107_s6, %s107_s6 }
  0x2a   :  { %127 = vlog2.f32 %v68_v3  ;;  %p179_p4 = scmp.lt.s32.totalorder %s177_s8, %s173_s7 }
  0x2c   :  { %p180_p5 = por %p179_p4, %p178_p3 }
  0x2e   :  { %p181_p6 = pnand %p180_p5, %p174_p2 }
  0x31   :  { %v122_v4 = vpop.eup %121 }
  0x32   :  { %v124_v6 = vpop.eup %123  ;;  %v62_v8 = vmul.f32 0.6931472, %v122_v4 }
  0x33   :  { %v126_v9 = vpop.eup %125  ;;  %v64_v10 = vmul.f32 0.6931472, %v124_v6 }
  0x34   :  { %v128_v11 = vpop.eup %127  ;;  %v65_v12 = vmax.f32 %v62_v8, -100.0  ;;  %v70_v13 = vmul.f32 0.6931472, %v126_v9 }
  0x35   :  { %v66_v15 = vmax.f32 %v64_v10, -100.0  ;;  %v72_v16 = vmul.f32 0.6931472, %v128_v11 }
  0x36   :  { %v73_v18 = vmax.f32 %v70_v13, -100.0  ;;  %v75_v19 = vmul.f32 %v65_v12, %v59_v5 }
  0x37   :  { %v74_v20 = vmax.f32 %v72_v16, -100.0  ;;  %v76_v21 = vmul.f32 %v66_v15, %v60_v7 }
  0x38   :  { %v79_v22 = vmul.f32 %v77_v14, %v73_v18 }
  0x39   :  { %v80_v23 = vmul.f32 %v78_v17, %v74_v20 }
  0x3a   :  { %v81_v24 = vadd.f32 %v79_v22, %v75_v19 }
  0x3b   :  { %v82_v25 = vadd.f32 %v80_v23, %v76_v21 }
  0x3c   :  { %v83_v26 = vsub.f32 0.0, %v81_v24 }
  0x3d   :  { %v84_v27 = vsub.f32 0.0, %v82_v25 }
  0x3f   :  { %v86_v28 = vadd.f32 %v84_v27, %v83_v26 }
  0x41   :  { %v93_v29 = vrot.slane %v86_v28, 4 }
  0x43   :  { %v94_v30 = vadd.f32 %v93_v29, %v86_v28 }
  0x45   :  { %v95_v31 = vrot.slane %v94_v30, 2 }
  0x47   :  { %v96_v32 = vadd.f32 %v95_v31, %v94_v30 }
  0x49   :  { %v97_v33 = vrot.slane %v96_v32, 1 }
  0x4b   :  { %v98_v34 = vadd.f32 %v97_v33, %v96_v32 }
  0x4d   :  { %99 = vst [vmem:[#allocation8] sm:$0x1] %v98_v34 }
  0x4e   :  { %184 = shalt.err (!%p181_p6)
}
  0x4f   :  { %s185_s11 = scalar_lea.hbm %s259_s2, 16 }
  0x50   :  { %p186_p7 = scmp.ne.s32.totalorder %s259_s2, %s185_s11  ;;  %p189_p8 = scmp.lt.u32.totalorder %s185_s11, %s259_s2 }
  0x52   :  { %p191_p9 = pnand %p189_p8, %p186_p7 }
  0x54   :  { %194 = shalt.err (!%p191_p9)
}
  0x55   :  { %109 = dma.vmem_to_hbm [thread:$0]  %s107_s6, 16, %s259_s2, [#allocation5]  }
  0x56   :  { %199 = dma.done.wait [#allocation5], 16  }
  0x57   :  { %200 = vsyncadd [#allocation5], 4294967280 }
  0x58   :  { %113 = vsyncpa [#allocation4], 1 }
  0x59   :  { %114 = vsyncpa [#allocation7], 1 }
  0x5a   :  { %115 = vsyncpa [#allocation5], 1 }

</bundles_post_ra>
